<compile_context>
chip_gen: v5e
topology: v5e:2x2
jax: 0.10.0
libtpu: 0.0.40
codegen_flags: <defaults>
</compile_context>

<pallas_src>
import functools

import jax
import jax.numpy as jnp
from jax import lax
from jax.experimental import pallas as pl
from jax.experimental.pallas import tpu as pltpu


def _attn_kernel(x_ref, c_ref, wq_ref, wk_ref, wv_ref, wo_ref, o_ref, *,
                 heads, dim_head, scale):
    """One batch element of linear cross attention (all heads at once).

    x_ref  : (1, N, Dq)      query tokens for batch b
    c_ref  : (1, M, Dc)      context tokens for batch b
    wq_ref : (Dq, H*dh)      merged Q projection (resident, same block every step)
    wk_ref : (Dc, H*dh)      merged K projection
    wv_ref : (Dc, H*dh)      merged V projection
    wo_ref : (H*dh, Dq)      merged output projection
    o_ref  : (1, N, Dq)      output for batch b
    """
    x = x_ref[0]                          # (N, Dq)
    c = c_ref[0]                          # (M, Dc)

    # Merged projections: one matmul each, f32 accumulation on the MXU.
    # Softmax scale folded into q once (single VPU pass over (N, H*dh)).
    q = jnp.dot(x, wq_ref[...], preferred_element_type=jnp.float32) * scale  # (N, H*dh)
    k = jnp.dot(c, wk_ref[...], preferred_element_type=jnp.float32)          # (M, H*dh)
    v = jnp.dot(c, wv_ref[...], preferred_element_type=jnp.float32)          # (M, H*dh)

    # Per-head attention: short static (unrolled) loop, no k transpose.
    vals = []
    for h in range(heads):
        lo = h * dim_head
        hi = lo + dim_head
        qh = q[:, lo:hi]                  # (N, dh)  (already scaled)
        kh = k[:, lo:hi]                  # (M, dh)
        vh = v[:, lo:hi]                  # (M, dh)

        # scores: einsum('i c, j c -> i j'), contraction on dh (no .T needed).
        s = lax.dot_general(qh, kh, (((1,), (1,)), ((), ())),
                            preferred_element_type=jnp.float32)              # (N, M)

        # numerically stable softmax over the context axis; 1/sum uses the EUP.
        s_max = jnp.max(s, axis=-1, keepdims=True)
        p = jnp.exp(s - s_max)
        p = p * pl.reciprocal(jnp.sum(p, axis=-1, keepdims=True), approx=True)

        # einsum('i j, j c -> i c')
        vals.append(jnp.dot(p, vh, preferred_element_type=jnp.float32))      # (N, dh)

    val = jnp.concatenate(vals, axis=-1)                                     # (N, H*dh)

    # Single merged output projection (K = H*dh), then one cast + one store.
    out = jnp.dot(val, wo_ref[...], preferred_element_type=jnp.float32)      # (N, Dq)
    o_ref[...] = out[None].astype(o_ref.dtype)


def linear_cross_attention(x, context, wq, wk, wv, wo, *, heads, dim_head):
    """Pallas implementation of LinearCrossAttention.forward.

    x:       (B, N, query_dim)
    context: (B, M, context_dim) or None (self-attention)
    wq: (query_dim,   heads*dim_head)   (in, out) orientation -> q = x @ wq
    wk: (context_dim, heads*dim_head)
    wv: (context_dim, heads*dim_head)
    wo: (heads*dim_head, query_dim)     out = value @ wo
    """
    if context is None:
        context = x

    B, N, Dq = x.shape
    _, M, Dc = context.shape
    H, dh = heads, dim_head
    inner = H * dh
    scale = dh ** (-0.5)

    kernel = functools.partial(_attn_kernel, heads=H, dim_head=dh, scale=scale)

    out = pl.pallas_call(
        kernel,
        out_shape=jax.ShapeDtypeStruct((B, N, Dq), x.dtype),
        grid_spec=pl.GridSpec(
            grid=(B,),
            in_specs=[
                pl.BlockSpec((1, N, Dq), lambda b: (b, 0, 0)),   # x (per batch)
                pl.BlockSpec((1, M, Dc), lambda b: (b, 0, 0)),   # context (per batch)
                # Full-extent weights: constant block index -> DMA'd once, kept
                # resident in VMEM across all batch steps.
                pl.BlockSpec((Dq, inner), lambda b: (0, 0)),     # Wq
                pl.BlockSpec((Dc, inner), lambda b: (0, 0)),     # Wk
                pl.BlockSpec((Dc, inner), lambda b: (0, 0)),     # Wv
                pl.BlockSpec((inner, Dq), lambda b: (0, 0)),     # Wo
            ],
            out_specs=pl.BlockSpec((1, N, Dq), lambda b: (b, 0, 0)),
        ),
        compiler_params=pltpu.CompilerParams(
            dimension_semantics=("parallel",)),   # batch axis shards across TCs
    )(x, context, wq, wk, wv, wo)
    return out


def _reference(x, context, wq, wk, wv, wo, *, heads, dim_head):
    """Pure-JAX reference mirroring the PyTorch forward exactly."""
    B, N, _ = x.shape
    _, M, _ = context.shape
    H, dh = heads, dim_head
    scale = dh ** (-0.5)
    q = x @ wq          # (B, N, H*dh)
    k = context @ wk    # (B, M, H*dh)
    v = context @ wv    # (B, M, H*dh)
    # 'b i (h c) -> (b h) i c'
    q = q.reshape(B, N, H, dh).transpose(0, 2, 1, 3)
    k = k.reshape(B, M, H, dh).transpose(0, 2, 1, 3)
    v = v.reshape(B, M, H, dh).transpose(0, 2, 1, 3)
    s = jnp.einsum('bhic,bhjc->bhij', q, k) * scale
    p = jax.nn.softmax(s, axis=-1)
    val = jnp.einsum('bhij,bhjc->bhic', p, v)
    # '(b h) i c -> b i (h c)'
    val = val.transpose(0, 2, 1, 3).reshape(B, N, H * dh)
    return val @ wo


if __name__ == "__main__":
    # Small, module-consistent shapes.
    B = 2          # batch
    N = 16         # query tokens ("(h, w)" flattened)
    M = 8          # context tokens ("embed")
    query_dim = 32
    context_dim = 32
    heads = 4
    dim_head = 16
    inner_dim = heads * dim_head

    key = jax.random.PRNGKey(0)
    kx, kc, kq, kk, kv, ko = jax.random.split(key, 6)

    x = jax.random.normal(kx, (B, N, query_dim), dtype=jnp.float32)
    context = jax.random.normal(kc, (B, M, context_dim), dtype=jnp.float32)

    # Deterministic synthetic parameters (nn.Linear bias=False), stored in
    # (in_features, out_features) orientation so that y = x @ W.
    wq = jax.random.normal(kq, (query_dim, inner_dim), dtype=jnp.float32) * 0.05
    wk = jax.random.normal(kk, (context_dim, inner_dim), dtype=jnp.float32) * 0.05
    wv = jax.random.normal(kv, (context_dim, inner_dim), dtype=jnp.float32) * 0.05
    wo = jax.random.normal(ko, (inner_dim, query_dim), dtype=jnp.float32) * 0.05

    out = linear_cross_attention(x, context, wq, wk, wv, wo,
                                 heads=heads, dim_head=dim_head)
    out = jax.block_until_ready(out)

    ref = _reference(x, context, wq, wk, wv, wo, heads=heads, dim_head=dim_head)
    assert out.shape == (B, N, query_dim)
    # Slightly relaxed tolerance to cover the EUP approximate reciprocal in the
    # softmax normalization; real correctness bugs are orders of magnitude larger.
    assert jnp.allclose(out, ref, atol=1e-3, rtol=1e-3), "mismatch vs reference"

    print("KERNEL_OK")
</pallas_src>

<mosaic_0001>
module attributes {stable_mosaic.version = 11 : i64} {
  func.func @_attn_kernel(%arg0: i32, %arg1: memref<1x16x32xf32, #tpu.memory_space<vmem>>, %arg2: memref<1x8x32xf32, #tpu.memory_space<vmem>>, %arg3: memref<32x64xf32, #tpu.memory_space<vmem>>, %arg4: memref<32x64xf32, #tpu.memory_space<vmem>>, %arg5: memref<32x64xf32, #tpu.memory_space<vmem>>, %arg6: memref<64x32xf32, #tpu.memory_space<vmem>>, %arg7: memref<1x16x32xf32, #tpu.memory_space<vmem>>) attributes {dimension_semantics = [#tpu.dimension_semantics<parallel>], iteration_bounds = array<i64: 2>, scalar_prefetch = 0 : i64, scratch_operands = 0 : i64, tpu.core_type = #tpu.core_type<tc>, window_params = [{transform_indices = @transform_0, window_bounds = array<i64: 1, 16, 32>}, {transform_indices = @transform_1, window_bounds = array<i64: 1, 8, 32>}, {pipeline_mode = #tpu.pipeline_mode<synchronous>, transform_indices = @transform_2, window_bounds = array<i64: 32, 64>}, {pipeline_mode = #tpu.pipeline_mode<synchronous>, transform_indices = @transform_3, window_bounds = array<i64: 32, 64>}, {pipeline_mode = #tpu.pipeline_mode<synchronous>, transform_indices = @transform_4, window_bounds = array<i64: 32, 64>}, {pipeline_mode = #tpu.pipeline_mode<synchronous>, transform_indices = @transform_5, window_bounds = array<i64: 64, 32>}, {transform_indices = @transform_6, window_bounds = array<i64: 1, 16, 32>}]} {
    %c0 = arith.constant 0 : index
    %c0_0 = arith.constant 0 : index
    %c0_1 = arith.constant 0 : index
    %0 = vector.load %arg1[%c0, %c0_0, %c0_1] : memref<1x16x32xf32, #tpu.memory_space<vmem>>, vector<1x16x32xf32>
    %1 = vector.shape_cast %0 : vector<1x16x32xf32> to vector<16x32xf32>
    %c0_2 = arith.constant 0 : index
    %c0_3 = arith.constant 0 : index
    %c0_4 = arith.constant 0 : index
    %2 = vector.load %arg2[%c0_2, %c0_3, %c0_4] : memref<1x8x32xf32, #tpu.memory_space<vmem>>, vector<1x8x32xf32>
    %3 = vector.shape_cast %2 : vector<1x8x32xf32> to vector<8x32xf32>
    %c0_5 = arith.constant 0 : index
    %c0_6 = arith.constant 0 : index
    %4 = vector.load %arg3[%c0_5, %c0_6] : memref<32x64xf32, #tpu.memory_space<vmem>>, vector<32x64xf32>
    %cst = arith.constant dense<0.000000e+00> : vector<16x64xf32>
    %5 = tpu.matmul %1, %4, %cst {dimension_numbers = #tpu.dot_dimension_numbers<[1], [0], [0], [1], [0, 0, 1, 1], [], []>} : vector<16x32xf32>, vector<32x64xf32>, vector<16x64xf32> -> vector<16x64xf32>
    %cst_7 = arith.constant 2.500000e-01 : f32
    %6 = vector.broadcast %cst_7 : f32 to vector<16x64xf32>
    %7 = arith.mulf %5, %6 : vector<16x64xf32>
    %c0_8 = arith.constant 0 : index
    %c0_9 = arith.constant 0 : index
    %8 = vector.load %arg4[%c0_8, %c0_9] : memref<32x64xf32, #tpu.memory_space<vmem>>, vector<32x64xf32>
    %cst_10 = arith.constant dense<0.000000e+00> : vector<8x64xf32>
    %9 = tpu.matmul %3, %8, %cst_10 {dimension_numbers = #tpu.dot_dimension_numbers<[1], [0], [0], [1], [0, 0, 1, 1], [], []>} : vector<8x32xf32>, vector<32x64xf32>, vector<8x64xf32> -> vector<8x64xf32>
    %c0_11 = arith.constant 0 : index
    %c0_12 = arith.constant 0 : index
    %10 = vector.load %arg5[%c0_11, %c0_12] : memref<32x64xf32, #tpu.memory_space<vmem>>, vector<32x64xf32>
    %cst_13 = arith.constant dense<0.000000e+00> : vector<8x64xf32>
    %11 = tpu.matmul %3, %10, %cst_13 {dimension_numbers = #tpu.dot_dimension_numbers<[1], [0], [0], [1], [0, 0, 1, 1], [], []>} : vector<8x32xf32>, vector<32x64xf32>, vector<8x64xf32> -> vector<8x64xf32>
    %12 = vector.extract_strided_slice %7 {offsets = [0, 0], sizes = [16, 16], strides = [1, 1]} : vector<16x64xf32> to vector<16x16xf32>
    %13 = vector.extract_strided_slice %9 {offsets = [0, 0], sizes = [8, 16], strides = [1, 1]} : vector<8x64xf32> to vector<8x16xf32>
    %14 = vector.extract_strided_slice %11 {offsets = [0, 0], sizes = [8, 16], strides = [1, 1]} : vector<8x64xf32> to vector<8x16xf32>
    %cst_14 = arith.constant dense<0.000000e+00> : vector<16x8xf32>
    %15 = tpu.matmul %12, %13, %cst_14 {dimension_numbers = #tpu.dot_dimension_numbers<[1], [1], [0], [0], [0, 0, 1, 0], [], []>} : vector<16x16xf32>, vector<8x16xf32>, vector<16x8xf32> -> vector<16x8xf32>
    %cst_15 = arith.constant dense<0xFF800000> : vector<16xf32>
    %16 = vector.multi_reduction <maximumf>, %15, %cst_15 [1] : vector<16x8xf32> to vector<16xf32>
    %17 = vector.shape_cast %16 : vector<16xf32> to vector<16x1xf32>
    %18 = vector.broadcast %17 : vector<16x1xf32> to vector<16x8xf32>
    %19 = arith.subf %15, %18 : vector<16x8xf32>
    %20 = math.exp %19 : vector<16x8xf32>
    %cst_16 = arith.constant dense<0.000000e+00> : vector<16xf32>
    %21 = vector.multi_reduction <add>, %20, %cst_16 [1] : vector<16x8xf32> to vector<16xf32>
    %22 = vector.shape_cast %21 : vector<16xf32> to vector<16x1xf32>
    %23 = tpu.reciprocal %22 {approx = true} : vector<16x1xf32> -> vector<16x1xf32>
    %24 = vector.broadcast %23 : vector<16x1xf32> to vector<16x8xf32>
    %25 = arith.mulf %20, %24 : vector<16x8xf32>
    %cst_17 = arith.constant dense<0.000000e+00> : vector<16x16xf32>
    %26 = tpu.matmul %25, %14, %cst_17 {dimension_numbers = #tpu.dot_dimension_numbers<[1], [0], [0], [1], [0, 0, 1, 1], [], []>} : vector<16x8xf32>, vector<8x16xf32>, vector<16x16xf32> -> vector<16x16xf32>
    %27 = vector.extract_strided_slice %7 {offsets = [0, 16], sizes = [16, 16], strides = [1, 1]} : vector<16x64xf32> to vector<16x16xf32>
    %28 = vector.extract_strided_slice %9 {offsets = [0, 16], sizes = [8, 16], strides = [1, 1]} : vector<8x64xf32> to vector<8x16xf32>
    %29 = vector.extract_strided_slice %11 {offsets = [0, 16], sizes = [8, 16], strides = [1, 1]} : vector<8x64xf32> to vector<8x16xf32>
    %cst_18 = arith.constant dense<0.000000e+00> : vector<16x8xf32>
    %30 = tpu.matmul %27, %28, %cst_18 {dimension_numbers = #tpu.dot_dimension_numbers<[1], [1], [0], [0], [0, 0, 1, 0], [], []>} : vector<16x16xf32>, vector<8x16xf32>, vector<16x8xf32> -> vector<16x8xf32>
    %cst_19 = arith.constant dense<0xFF800000> : vector<16xf32>
    %31 = vector.multi_reduction <maximumf>, %30, %cst_19 [1] : vector<16x8xf32> to vector<16xf32>
    %32 = vector.shape_cast %31 : vector<16xf32> to vector<16x1xf32>
    %33 = vector.broadcast %32 : vector<16x1xf32> to vector<16x8xf32>
    %34 = arith.subf %30, %33 : vector<16x8xf32>
    %35 = math.exp %34 : vector<16x8xf32>
    %cst_20 = arith.constant dense<0.000000e+00> : vector<16xf32>
    %36 = vector.multi_reduction <add>, %35, %cst_20 [1] : vector<16x8xf32> to vector<16xf32>
    %37 = vector.shape_cast %36 : vector<16xf32> to vector<16x1xf32>
    %38 = tpu.reciprocal %37 {approx = true} : vector<16x1xf32> -> vector<16x1xf32>
    %39 = vector.broadcast %38 : vector<16x1xf32> to vector<16x8xf32>
    %40 = arith.mulf %35, %39 : vector<16x8xf32>
    %cst_21 = arith.constant dense<0.000000e+00> : vector<16x16xf32>
    %41 = tpu.matmul %40, %29, %cst_21 {dimension_numbers = #tpu.dot_dimension_numbers<[1], [0], [0], [1], [0, 0, 1, 1], [], []>} : vector<16x8xf32>, vector<8x16xf32>, vector<16x16xf32> -> vector<16x16xf32>
    %42 = vector.extract_strided_slice %7 {offsets = [0, 32], sizes = [16, 16], strides = [1, 1]} : vector<16x64xf32> to vector<16x16xf32>
    %43 = vector.extract_strided_slice %9 {offsets = [0, 32], sizes = [8, 16], strides = [1, 1]} : vector<8x64xf32> to vector<8x16xf32>
    %44 = vector.extract_strided_slice %11 {offsets = [0, 32], sizes = [8, 16], strides = [1, 1]} : vector<8x64xf32> to vector<8x16xf32>
    %cst_22 = arith.constant dense<0.000000e+00> : vector<16x8xf32>
    %45 = tpu.matmul %42, %43, %cst_22 {dimension_numbers = #tpu.dot_dimension_numbers<[1], [1], [0], [0], [0, 0, 1, 0], [], []>} : vector<16x16xf32>, vector<8x16xf32>, vector<16x8xf32> -> vector<16x8xf32>
    %cst_23 = arith.constant dense<0xFF800000> : vector<16xf32>
    %46 = vector.multi_reduction <maximumf>, %45, %cst_23 [1] : vector<16x8xf32> to vector<16xf32>
    %47 = vector.shape_cast %46 : vector<16xf32> to vector<16x1xf32>
    %48 = vector.broadcast %47 : vector<16x1xf32> to vector<16x8xf32>
    %49 = arith.subf %45, %48 : vector<16x8xf32>
    %50 = math.exp %49 : vector<16x8xf32>
    %cst_24 = arith.constant dense<0.000000e+00> : vector<16xf32>
    %51 = vector.multi_reduction <add>, %50, %cst_24 [1] : vector<16x8xf32> to vector<16xf32>
    %52 = vector.shape_cast %51 : vector<16xf32> to vector<16x1xf32>
    %53 = tpu.reciprocal %52 {approx = true} : vector<16x1xf32> -> vector<16x1xf32>
    %54 = vector.broadcast %53 : vector<16x1xf32> to vector<16x8xf32>
    %55 = arith.mulf %50, %54 : vector<16x8xf32>
    %cst_25 = arith.constant dense<0.000000e+00> : vector<16x16xf32>
    %56 = tpu.matmul %55, %44, %cst_25 {dimension_numbers = #tpu.dot_dimension_numbers<[1], [0], [0], [1], [0, 0, 1, 1], [], []>} : vector<16x8xf32>, vector<8x16xf32>, vector<16x16xf32> -> vector<16x16xf32>
    %57 = vector.extract_strided_slice %7 {offsets = [0, 48], sizes = [16, 16], strides = [1, 1]} : vector<16x64xf32> to vector<16x16xf32>
    %58 = vector.extract_strided_slice %9 {offsets = [0, 48], sizes = [8, 16], strides = [1, 1]} : vector<8x64xf32> to vector<8x16xf32>
    %59 = vector.extract_strided_slice %11 {offsets = [0, 48], sizes = [8, 16], strides = [1, 1]} : vector<8x64xf32> to vector<8x16xf32>
    %cst_26 = arith.constant dense<0.000000e+00> : vector<16x8xf32>
    %60 = tpu.matmul %57, %58, %cst_26 {dimension_numbers = #tpu.dot_dimension_numbers<[1], [1], [0], [0], [0, 0, 1, 0], [], []>} : vector<16x16xf32>, vector<8x16xf32>, vector<16x8xf32> -> vector<16x8xf32>
    %cst_27 = arith.constant dense<0xFF800000> : vector<16xf32>
    %61 = vector.multi_reduction <maximumf>, %60, %cst_27 [1] : vector<16x8xf32> to vector<16xf32>
    %62 = vector.shape_cast %61 : vector<16xf32> to vector<16x1xf32>
    %63 = vector.broadcast %62 : vector<16x1xf32> to vector<16x8xf32>
    %64 = arith.subf %60, %63 : vector<16x8xf32>
    %65 = math.exp %64 : vector<16x8xf32>
    %cst_28 = arith.constant dense<0.000000e+00> : vector<16xf32>
    %66 = vector.multi_reduction <add>, %65, %cst_28 [1] : vector<16x8xf32> to vector<16xf32>
    %67 = vector.shape_cast %66 : vector<16xf32> to vector<16x1xf32>
    %68 = tpu.reciprocal %67 {approx = true} : vector<16x1xf32> -> vector<16x1xf32>
    %69 = vector.broadcast %68 : vector<16x1xf32> to vector<16x8xf32>
    %70 = arith.mulf %65, %69 : vector<16x8xf32>
    %cst_29 = arith.constant dense<0.000000e+00> : vector<16x16xf32>
    %71 = tpu.matmul %70, %59, %cst_29 {dimension_numbers = #tpu.dot_dimension_numbers<[1], [0], [0], [1], [0, 0, 1, 1], [], []>} : vector<16x8xf32>, vector<8x16xf32>, vector<16x16xf32> -> vector<16x16xf32>
    %72 = tpu.concatenate %26, %41, %56, %71 in 1 : vector<16x16xf32>, vector<16x16xf32>, vector<16x16xf32>, vector<16x16xf32> -> vector<16x64xf32>
    %c0_30 = arith.constant 0 : index
    %c0_31 = arith.constant 0 : index
    %73 = vector.load %arg6[%c0_30, %c0_31] : memref<64x32xf32, #tpu.memory_space<vmem>>, vector<64x32xf32>
    %cst_32 = arith.constant dense<0.000000e+00> : vector<16x32xf32>
    %74 = tpu.matmul %72, %73, %cst_32 {dimension_numbers = #tpu.dot_dimension_numbers<[1], [0], [0], [1], [0, 0, 1, 1], [], []>} : vector<16x64xf32>, vector<64x32xf32>, vector<16x32xf32> -> vector<16x32xf32>
    %75 = vector.shape_cast %74 : vector<16x32xf32> to vector<1x16x32xf32>
    %c0_33 = arith.constant 0 : index
    %c0_34 = arith.constant 0 : index
    %c0_35 = arith.constant 0 : index
    %76 = vector.load %arg7[%c0_33, %c0_34, %c0_35] : memref<1x16x32xf32, #tpu.memory_space<vmem>>, vector<1x16x32xf32>
    tpu.vector_store %arg7[%c0_33, %c0_34, %c0_35], %75 {strides = array<i32>} : memref<1x16x32xf32, #tpu.memory_space<vmem>>, vector<1x16x32xf32>,
    return
  }
  func.func @transform_0(%arg0: i32) -> (i32, i32, i32) {
    %c0_i32 = arith.constant 0 : i32
    %c0_i32_0 = arith.constant 0 : i32
    %c0_i32_1 = arith.constant 0 : i32
    return %arg0, %c0_i32, %c0_i32_0 : i32, i32, i32
  }
  func.func @transform_1(%arg0: i32) -> (i32, i32, i32) {
    %c0_i32 = arith.constant 0 : i32
    %c0_i32_0 = arith.constant 0 : i32
    %c0_i32_1 = arith.constant 0 : i32
    return %arg0, %c0_i32, %c0_i32_0 : i32, i32, i32
  }
  func.func @transform_2(%arg0: i32) -> (i32, i32) {
    %c0_i32 = arith.constant 0 : i32
    %c0_i32_0 = arith.constant 0 : i32
    %c0_i32_1 = arith.constant 0 : i32
    return %c0_i32, %c0_i32_0 : i32, i32
  }
  func.func @transform_3(%arg0: i32) -> (i32, i32) {
    %c0_i32 = arith.constant 0 : i32
    %c0_i32_0 = arith.constant 0 : i32
    %c0_i32_1 = arith.constant 0 : i32
    return %c0_i32, %c0_i32_0 : i32, i32
  }
  func.func @transform_4(%arg0: i32) -> (i32, i32) {
    %c0_i32 = arith.constant 0 : i32
    %c0_i32_0 = arith.constant 0 : i32
    %c0_i32_1 = arith.constant 0 : i32
    return %c0_i32, %c0_i32_0 : i32, i32
  }
  func.func @transform_5(%arg0: i32) -> (i32, i32) {
    %c0_i32 = arith.constant 0 : i32
    %c0_i32_0 = arith.constant 0 : i32
    %c0_i32_1 = arith.constant 0 : i32
    return %c0_i32, %c0_i32_0 : i32, i32
  }
  func.func @transform_6(%arg0: i32) -> (i32, i32, i32) {
    %c0_i32 = arith.constant 0 : i32
    %c0_i32_0 = arith.constant 0 : i32
    %c0_i32_1 = arith.constant 0 : i32
    return %arg0, %c0_i32, %c0_i32_0 : i32, i32, i32
  }
}

</mosaic_0001>

<bundles_post_ra>
// kernel: tpu_custom_call.1
= control target key start
LH: loop header
LB: loop body
LE: loop exit
PB: predicated region body
PF: predicated region fallthrough
CT: control target
= control target key end

     0   :  { %11 = vsyncpa [#allocation3], 0  ;;  %s1507_s0 = inlined_call_operand.vmem [shape: f32[2,16,32], index: 0, kind: input, shape index: {}]   ;;  %s1508_s1 = inlined_call_operand.hbm [shape: f32[2,8,32], index: 1, kind: input, shape index: {}]   ;;  %s1509_s2 = inlined_call_operand.vmem [shape: f32[32,64], index: 2, kind: input, shape index: {}]   ;;  %s1510_s3 = inlined_call_operand.vmem [shape: f32[32,64], index: 3, kind: input, shape index: {}]   ;;  %s1511_s4 = inlined_call_operand.hbm [shape: f32[32,64], index: 4, kind: input, shape index: {}]   ;;  %s1512_s5 = inlined_call_operand.vmem [shape: f32[64,32], index: 5, kind: input, shape index: {}]   ;;  %s1513_s6 = inlined_call_operand.hbm [shape: f32[2,16,32], index: 6, kind: output, shape index: {}]  }
   0x1   :  { %13 = vsyncpa [#allocation3 + $0x1], 0 }
   0x2   :  { %14 = vsyncpa [#allocation6], 0 }
   0x3   :  { %15 = vsyncpa [#allocation4], 0 }
   0x4   :  { %17 = vsyncpa [#allocation4 + $0x1], 0  ;;  %s1253_s21 = smov 0   ;;  %s1255_s22 = smov 0  }
   0x5   :  { %s1257_s23 = smov 0   ;;  %s1259_s24 = smov 0  }
   0x6 LB: > { %s207_s27 = sshll.u32 %s1511_s4, 4  ;;  %s1277_s28 = sadd.s32 4294967295, %s1205_s24   ;;  %s1205_s24 = sphi %s1259_s24, %s1523_s24   ;;  %s1201_s23 = sphi %s1257_s23, %s1522_s23   ;;  %s1197_s22 = sphi %s1255_s22, %s1521_s22   ;;  %s1193_s21 = sphi %s1253_s21, %s1520_s21   ;;  %s208_s27 = int_to_ptr.hbm [resolvable:$true] %s207_s27 }
   0x7   : > { %p932_p0 = scmp.ge.s32.totalorder %s1205_s24, 1  ;;  %p70_p1 = scmp.eq.s32.totalorder %s1277_s28, 0 }
   0x8   : > { %p190_p2 = scmp.lt.s32.totalorder %s1205_s24, 3  ;;  %s1207_s30 = smov [#allocation5]  }
   0x9   : > { %s209_s7 = sshll.u32 %s1207_s30, 4  ;;  %s1208_s8 = smov 128   ;;  %s210_s7 = int_to_ptr.vmem [resolvable:$true] %s209_s7 }
   0xa   : > { %p1282_p3 = pnand %p932_p0, %p190_p2  ;;  %s1209_s9 = smov 8  }
   0xb   : > { %s931_s10 = sadd.s32 4294967294, %s1205_s24   ;;  %s1293_s11 = sadd.s32 1, %s1205_s24  }
   0xc   : > { %p984_p4 = pneg %p1282_p3  ;;  %s56_s12 = sadd.s32 1, %s1201_s23 }
   0xd   : > { %s53_s13 = ssub.s32 %s1205_s24, %s1293_s11  ;;  %p63_p7 = scmp.ne.s32.totalorder %s1201_s23, %s1197_s22 }
   0xe   : > { %p985_p6 = pnand %p984_p4, %p70_p1  ;;  %p54_p8 = scmp.eq.s32.totalorder %s53_s13, 0 }
   0xf   : > { %p64_p9 = scmp.eq.s32.totalorder %s1205_s24, 0  ;;  %p69_p10 = scmp.ne.s32.totalorder %s1197_s22, %s1193_s21 }
  0x10   : > { %987 = dma.hbm_to_vmem [thread:$0]  (!%p985_p6), %s208_s27, 512, %s210_s7, [#allocation6], %s1208_s8, %s1208_s8, %s1209_s9  }
  0x11   : > { %p177_p11 = scmp.eq.s32.totalorder %s1277_s28, 1  ;;  %p1309_p12 = por %p70_p1, %p69_p10 }
  0x12   : > { %s1305_s14 = scalar_select %p54_p8, %s1201_s23, %s56_s12  }
  0x13   : > { %p1313_p13 = por %p177_p11, %p63_p7  ;;  %p183_p0 = scmp.eq.s32.totalorder %s931_s10, 1 }
  0x14   : > { %p65_p2 = por %p64_p9, %p63_p7  ;;  %s234_s17 = sand.u32 1, %s1201_s23  }
  0x15   : > { %p1318_p4 = por %p183_p0, %p69_p10  ;;  %p997_p6 = scmp.lt.s32.totalorder %s1205_s24, 2 }
  0x16   : > { %s935_s19 = sshll.u32 %s234_s17, 3  ;;  %s936_s20 = sshll.u32 %s1205_s24, 3 }
  0x17   : > { %s242_s27 = scalar_lea.hbm %s1508_s1, %s936_s20  ;;  %s238_s7 = scalar_lea.vmem [#allocation2], %s935_s19 }
  0x18   : > { %s244_s30 = sshll.u32 %s242_s27, 4  ;;  %s246_s8 = sshll.u32 %s238_s7, 4  ;;  %s245_s30 = int_to_ptr.hbm [resolvable:$true] %s244_s30  ;;  %s247_s8 = int_to_ptr.vmem [resolvable:$true] %s246_s8 }
  0x19   : > { %p1327_p8 = pnand %p997_p6, %p65_p2  ;;  %s235_s10 = scalar_lea.sflag [#allocation3], %s234_s17 }
  0x1a   : > { %s1105_s12 = sshra.s32 %s245_s30, 4  ;;  %s1112_s19 = scalar_lea.hbm %s1508_s1, 16  ;;  %s1106_s12 = int_to_ptr.hbm [resolvable:$true] %s1105_s12 }
  0x1b   : > { %s1107_s13 = scalar_lea.hbm %s1106_s12, 8  ;;  %p1109_p9 = pneg %p1327_p8 }
  0x1c   : > { %p1108_p7 = scmp.ne.s32.totalorder %s1106_s12, %s1107_s13  ;;  %p1113_p0 = scmp.lt.s32.totalorder %s1106_s12, %s1508_s1 }
  0x1d   : > { %p1114_p2 = scmp.lt.s32.totalorder %s1112_s19, %s1107_s13 }
  0x1e   : > { %p1110_p10 = pnand %p1109_p9, %p1108_p7 }
  0x1f   : > { %p1115_p6 = por %p1114_p2, %p1113_p0 }
  0x20   : > { %p1111_p11 = pneg %p1110_p10 }
  0x22   : > { %p1116_p5 = pnand %p1115_p6, %p1111_p11 }
  0x24   : > { %1119 = shalt.err (!%p1116_p5)
}
  0x25   : > { %991 = dma.hbm_to_vmem [thread:$0]  (!%p1327_p8), %s245_s30, 128, %s247_s8, %s235_s10  }
  0x26   : > { %255 = sbr.rel (%p1282_p3) target bundleno = 1095 (0x447), region = 44  ;;  %s1344_s17 = sand.u32 (!%p1282_p3), 1, %s1197_s22  }
  0x27   : > { %s938_s7 = sshll.u32 (!%p1282_p3), %s1344_s17, 3  ;;  %s258_s20 = scalar_lea.sflag (!%p1282_p3), [#allocation3], %s1344_s17 }
  0x28   : > { %s261_s25 = scalar_lea.vmem (!%p1282_p3), [#allocation2], %s938_s7 }
  0x2b   : > { %1180 = dma.done.wait (%p1309_p12), %s258_s20, 128  }
  0x2c   : > { %1182 = vsyncadd (%p1309_p12), %s258_s20, 4294967168 }
  0x2d   : > { %1184 = dma.done.wait (%p70_p1), [#allocation6], 512  }
  0x2e   : > { %1186 = vsyncadd (%p70_p1), [#allocation6], 4294966784  ;;  %p301_p3 = scmp.lt.s32.totalorder %s1277_s28, 1  ;;  %v312_v0 = vld [vmem:[%s1509_s2 + $0x18] sm:$0xff]  ;;  %v311_v2 = vld [vmem:[%s1509_s2 + $0x10] sm:$0xff]  ;;  %vm313_vm0 = vcmask 261120  }
  0x2f   : > { %v348_v1 = vld [vmem:[%s1510_s3 + $0x18] sm:$0xff]  ;;  %332 = vmatpush.msra.mxu0 %v312_v0  ;;  %v347_v3 = vld [vmem:[%s1510_s3 + $0x10] sm:$0xff]  ;;  %v310_v4 = vld [vmem:[%s1509_s2 + $0x8] sm:$0xff]  ;;  %vm396_vm1 = vcmask 130048   ;;  %s1211_s26 = smov 80   ;;  %vm429_vm2 = vcmask 64512  }
  0x30   : > { %s302_s29 = scalar_select %p301_p3, %s1277_s28, 1  ;;  %364 = vmatpush.msra.mxu1 %v348_v1  ;;  %v346_v5 = vld [vmem:[%s1510_s3 + $0x8] sm:$0xff]  ;;  %v309_v6 = vld [vmem:[%s1509_s2] sm:$0xff]  ;;  %v373_v18 = vld [vmem:[#allocation5 + $0x8] sm:$0xff]  ;;  %vm777_vm3 = vcmask 392192   ;;  %vm788_vm4 = vcmask 523264  }
  0x31   : > { %333 = vmatpush.msra.mxu0 %v311_v2  ;;  %v345_v7 = vld [vmem:[%s1510_s3] sm:$0xff]  ;;  %v375_v16 = vld [vmem:[#allocation5 + $0x18] sm:$0xff]  ;;  %v372_v19 = vld [vmem:[#allocation5] sm:$0xff]  ;;  %s1213_s27 = smov 16   ;;  %s1214_s7 = smov 32  }
  0x32   : > { %s974_s30 = sshll.u32 %s302_s29, 4  ;;  %365 = vmatpush.msra.mxu1 %v347_v3  ;;  %v308_v9 = vld [vmem:[%s261_s25] sm:$0xff]  ;;  %s1212_s25 = smov 96   ;;  %388 = vmatpush.msra.mxu2 %v375_v16 }
  0x33   : > { %s305_s10 = scalar_lea.vmem %s1507_s0, %s974_s30  ;;  %334 = vmatpush.msra.mxu0 %v310_v4  ;;  %s1210_s30 = smov 112   ;;  %v374_v17 = vld [vmem:[#allocation5 + $0x10] sm:$0xff] }
  0x34   : > { %366 = vmatpush.msra.mxu1 %v346_v5  ;;  %v306_v8 = vld [vmem:[%s305_s10] sm:$0xff]  ;;  %v307_v10 = vld [vmem:[%s305_s10 + $0x8] sm:$0xff]  ;;  %389 = vmatpush.msra.mxu2 %v374_v17  ;;  %s1215_s20 = smov 48   ;;  %s940_s9 = sshll.u32 %s1344_s17, 4 }
  0x35   : > { %335 = vmatpush.msra.mxu0 %v309_v6  ;;  %s975_s10 = sshll.u32 %s1277_s28, 4  ;;  %s300_s12 = scalar_lea.vmem [#allocation7], %s940_s9 }
  0x36   : > { %367 = vmatpush.msra.mxu1 %v345_v7  ;;  %943 = vmatmul.msk.f32.vlgmr.msra.gmra.mxu0 %vm313_vm0, %v306_v8  ;;  %s832_s19 = scalar_lea.hbm %s1513_s6, %s975_s10  ;;  %s1155_s29 = scalar_lea.hbm %s1513_s6, 32 }
  0x37   : > { %945 = vmatmul.msk.f32.vlgmr.msra.gmra.mxu1 %vm313_vm0, %v308_v9  ;;  %390 = vmatpush.msra.mxu2 %v373_v18 }
  0x39   : > { %391 = vmatpush.msra.mxu2 %v372_v19 }
  0x3a   : > { %946 = vmatmul.msk.f32.vlgmr.msra.gmra.mxu2 %vm313_vm0, %v308_v9 }
  0x3e   : > { %944 = vmatmul.msk.f32.gmra.mxu0 %vm313_vm0, %v307_v10 }
  0xb3   : > { %v337_v11 = vpop.f32.mrf.mxu0 }
  0xb4   : > { %v369_v12 = vpop.f32.mrf.mxu1  ;;  %v343_v13 = vmul.f32 0.25, %v337_v11 }
  0xb5   : > { %485 = vrot.lane.b32.xlu0 %v369_v12, %s1210_s30  ;;  %947 = vmatpush.xpose.msk.msra.mxu3 %vm396_vm1, %v369_v12 }
  0xb6   : > { %660 = vrot.lane.b32.xlu2 %v343_v13, %s1211_s26 }
  0xb8   : > { %948 = vmatmul.msk.f32.vlgmr.msra.gmra.mxu3 %vm396_vm1, %v343_v13 }
  0xbb   : > { %v340_v14 = vpop.f32.mrf.mxu0 }
  0xbc   : > { %v344_v15 = vmul.f32 0.25, %v340_v14 }
  0xbd   : > { %481 = vrot.lane.b32.xlu0 %v343_v13, %s1210_s30  ;;  %v1412_v33 = vpop.f32.mrf.mxu2 }
  0xbe   : > { %575 = vrot.lane.b32.xlu2 %v369_v12, %s1212_s25  ;;  %483 = vrot.lane.b32.xlu1 %v344_v15, %s1210_s30 }
  0xbf   : > { %473 = vmatpush.msrb.mxu1 %v1412_v33 }
  0xc0   : > { %949 = vmatmul.msk.f32.gmra.mxu3 %vm396_vm1, %v344_v15 }
  0xc5   : > { %662 = vrot.lane.b32.xlu0 %v344_v15, %s1211_s26 }
  0xc6   : > { %573 = vrot.lane.b32.xlu2 %v344_v15, %s1212_s25  ;;  %664 = vrot.lane.b32.xlu1 %v369_v12, %s1211_s26 }
  0xce   : > { %571 = vrot.lane.b32.xlu1 %v343_v13, %s1212_s25 }
 0x110   : > { %v661_v20 = vpop.permute.xlu2 %660 }
 0x118   : > { %v576_v21 = vpop.permute.xlu2 %575 }
 0x119   : > { %957 = vmatpush.xpose.msk.msrb.mxu0 %vm396_vm1, %v576_v21 }
 0x120   : > { %v574_v32 = vpop.permute.xlu2 %573 }
 0x127   : > { %v486_v22 = vpop.permute.xlu0 %485 }
 0x128   : > { %952 = vmatpush.xpose.msk.msrb.mxu2 %vm396_vm1, %v486_v22 }
 0x12f   : > { %v482_v23 = vpop.permute.xlu0 %481 }
 0x130   : > { %953 = vmatmul.msk.f32.vlgmr.msrb.gmra.mxu2 %vm396_vm1, %v482_v23  ;;  %v484_v24 = vpop.permute.xlu1 %483 }
 0x137   : > { %v663_v31 = vpop.permute.xlu0 %662 }
 0x138   : > { %954 = vmatmul.msk.f32.gmra.mxu2 %vm396_vm1, %v484_v24  ;;  %v665_v25 = vpop.permute.xlu1 %664 }
 0x139   : > { %962 = vmatpush.xpose.msk.msra.mxu2 %vm396_vm1, %v665_v25 }
 0x13b   : > { %v423_v26 = vpop.f32.mrf.mxu3 }
 0x13c   : > { %v430_v27 = vsel %vm429_vm2, %v423_v26, -inf }
 0x13d   : > { %431 = vmax.xlane.f32.xlu1 %v430_v27 }
 0x140   : > { %963 = vmatmul.msk.f32.vlgmr.msra.gmra.mxu2 %vm396_vm1, %v661_v20  ;;  %v572_v28 = vpop.permute.xlu1 %571 }
 0x141   : > { %958 = vmatmul.msk.f32.vlgmr.msrb.gmra.mxu0 %vm396_vm1, %v572_v28 }
 0x143   : > { %v426_v29 = vpop.f32.mrf.mxu3 }
 0x144   : > { %v433_v30 = vsel %vm429_vm2, %v426_v29, -inf }
 0x145   : > { %434 = vmax.xlane.f32.xlu2 %v433_v30 }
 0x148   : > { %964 = vmatmul.msk.f32.gmra.mxu2 %vm396_vm1, %v663_v31 }
 0x149   : > { %959 = vmatmul.msk.f32.gmra.mxu0 %vm396_vm1, %v574_v32 }
 0x1b0   : > { %v432_v34 = vpop.xlane.xlu1 %431 }
 0x1b1   : > { %v436_v35 = vsub.f32 %v423_v26, %v432_v34 }
 0x1b3   : > { %v510_v36 = vpop.f32.mrf.mxu2  ;;  %v438_v38 = vmul.f32 1.442695, %v436_v35 }
 0x1b4   : > { %v516_v37 = vsel %vm429_vm2, %v510_v36, -inf }
 0x1b5   : > { %517 = vmax.xlane.f32.xlu0 %v516_v37  ;;  %1043 = vpow2.f32 %v438_v38 }
 0x1b8   : > { %v435_v42 = vpop.xlane.xlu2 %434 }
 0x1b9   : > { %v437_v45 = vsub.f32 %v426_v29, %v435_v42 }
 0x1bb   : > { %v513_v39 = vpop.f32.mrf.mxu2  ;;  %v1044_v44 = vpop.eup %1043  ;;  %v440_v49 = vmul.f32 1.442695, %v437_v45 }
 0x1bc   : > { %v519_v40 = vsel %vm429_vm2, %v513_v39, -inf  ;;  %v442_v48 = vsel %vm429_vm2, %v1044_v44, 0.0 }
 0x1bd   : > { %520 = vmax.xlane.f32.xlu2 %v519_v40  ;;  %1045 = vpow2.f32 %v440_v49 }
 0x1be   : > { %v600_v41 = vpop.f32.mrf.mxu0 }
 0x1bf   : > { %v606_v43 = vsel %vm429_vm2, %v600_v41, -inf }
 0x1c0   : > { %607 = vmax.xlane.f32.xlu1 %v606_v43 }
 0x1c3   : > { %v689_v46 = vpop.f32.mrf.mxu2  ;;  %v1046_v54 = vpop.eup %1045 }
 0x1c4   : > { %v695_v47 = vsel %vm429_vm2, %v689_v46, -inf  ;;  %v445_v55 = vsel %vm429_vm2, %v1046_v54, 0.0 }
 0x1c5   : > { %696 = vmax.xlane.f32.xlu0 %v695_v47  ;;  %443 = vadd.xlane.f32.xlu2 %v442_v48 }
 0x1c6   : > { %v603_v50 = vpop.f32.mrf.mxu0 }
 0x1c7   : > { %v609_v52 = vsel %vm429_vm2, %v603_v50, -inf }
 0x1cb   : > { %v692_v51 = vpop.f32.mrf.mxu2 }
 0x1cc   : > { %v698_v53 = vsel %vm429_vm2, %v692_v51, -inf }
 0x1cd   : > { %610 = vmax.xlane.f32.xlu0 %v609_v52  ;;  %699 = vmax.xlane.f32.xlu2 %v698_v53 }
 0x1d5   : > { %446 = vadd.xlane.f32.xlu2 %v445_v55 }
 0x1d9   : > { %539 = vrot.lane.b32.xlu1 %v1412_v33, %s1210_s30  ;;  %s833_s30 = sshll.u32 %s300_s12, 4  ;;  %s834_s30 = int_to_ptr.vmem [resolvable:$true] %s833_s30 }
 0x228   : > { %v518_v56 = vpop.xlane.xlu0 %517 }
 0x229   : > { %v522_v57 = vsub.f32 %v510_v36, %v518_v56 }
 0x22b   : > { %v524_v58 = vmul.f32 1.442695, %v522_v57  ;;  %v787_v57 = vld [vmem:[%s1512_s5 + $0x38] sm:$0xff] }
 0x22c   : > { %803 = vmatpush.msra.mxu0 %v787_v57 }
 0x22d   : > { %1047 = vpow2.f32 %v524_v58  ;;  %v786_v58 = vld [vmem:[%s1512_s5 + $0x30] sm:$0xff] }
 0x22e   : > { %804 = vmatpush.msra.mxu0 %v786_v58 }
 0x230   : > { %v521_v59 = vpop.xlane.xlu2 %520 }
 0x231   : > { %v523_v60 = vsub.f32 %v513_v39, %v521_v59  ;;  %v785_v59 = vld [vmem:[%s1512_s5 + $0x28] sm:$0xff] }
 0x232   : > { %805 = vmatpush.msra.mxu0 %v785_v59 }
 0x233   : > { %v1048_v61 = vpop.eup %1047  ;;  %v526_v62 = vmul.f32 1.442695, %v523_v60  ;;  %v608_v63 = vpop.xlane.xlu1 %607  ;;  %v784_v60 = vld [vmem:[%s1512_s5 + $0x20] sm:$0xff] }
 0x234   : > { %v528_v0 = vsel %vm429_vm2, %v1048_v61, 0.0  ;;  %v612_v1 = vsub.f32 %v600_v41, %v608_v63  ;;  %806 = vmatpush.msra.mxu0 %v784_v60  ;;  %v781_v63 = vld [vmem:[%s1512_s5 + $0x8] sm:$0xff] }
 0x235   : > { %1049 = vpow2.f32 %v526_v62  ;;  %529 = vadd.xlane.f32.xlu1 %v528_v0  ;;  %v782_v62 = vld [vmem:[%s1512_s5 + $0x10] sm:$0xff]  ;;  %v780_v0 = vld [vmem:[%s1512_s5] sm:$0xff] }
 0x236   : > { %v614_v2 = vmul.f32 1.442695, %v612_v1 }
 0x238   : > { %v697_v3 = vpop.xlane.xlu0 %696  ;;  %v444_v4 = vpop.xlane.xlu2 %443  ;;  %1051 = vpow2.f32 %v614_v2 }
 0x239   : > { %v701_v5 = vsub.f32 %v689_v46, %v697_v3  ;;  %1053 = vrcp.f32 %v444_v4 }
 0x23b   : > { %v1050_v6 = vpop.eup %1049  ;;  %v703_v7 = vmul.f32 1.442695, %v701_v5 }
 0x23c   : > { %v531_v8 = vsel %vm429_vm2, %v1050_v6, 0.0 }
 0x23d   : > { %1055 = vpow2.f32 %v703_v7  ;;  %532 = vadd.xlane.f32.xlu0 %v531_v8 }
 0x23e   : > { %v1052_v9 = vpop.eup %1051 }
 0x23f   : > { %v1054_v10 = vpop.eup %1053  ;;  %v618_v12 = vsel %vm429_vm2, %v1052_v9, 0.0 }
 0x240   : > { %v700_v11 = vpop.xlane.xlu2 %699  ;;  %v611_v13 = vpop.xlane.xlu0 %610  ;;  %619 = vadd.xlane.f32.xlu2 %v618_v12  ;;  %v450_v15 = vmul.f32 %v1054_v10, %v1044_v44 }
 0x241   : > { %v702_v14 = vsub.f32 %v692_v51, %v700_v11  ;;  %v613_v18 = vsub.f32 %v603_v50, %v611_v13 }
 0x242   : > { %950 = vmatmul.msk.f32.vlgmr.msrb.gmra.mxu1 %vm429_vm2, %v450_v15 }
 0x243   : > { %v1056_v16 = vpop.eup %1055  ;;  %v705_v17 = vmul.f32 1.442695, %v702_v14  ;;  %v616_v20 = vmul.f32 1.442695, %v613_v18 }
 0x244   : > { %v707_v19 = vsel %vm429_vm2, %v1056_v16, 0.0 }
 0x245   : > { %708 = vadd.xlane.f32.xlu0 %v707_v19  ;;  %1057 = vpow2.f32 %v705_v17 }
 0x248   : > { %v447_v21 = vpop.xlane.xlu2 %446 }
 0x249   : > { %1059 = vrcp.f32 %v447_v21 }
 0x24a   : > { %1061 = vpow2.f32 %v616_v20 }
 0x24b   : > { %v1058_v22 = vpop.eup %1057  ;;  %v540_v23 = vpop.permute.xlu1 %539 }
 0x24c   : > { %563 = vmatpush.msrb.mxu3 %v540_v23  ;;  %v710_v24 = vsel %vm429_vm2, %v1058_v22, 0.0 }
 0x24d   : > { %711 = vadd.xlane.f32.xlu0 %v710_v24 }
 0x24e   : > { %628 = vrot.lane.b32.xlu1 %v1412_v33, %s1212_s25  ;;  %s821_s25 = scalar_lea.sflag [#allocation4], %s1344_s17 }
 0x24f   : > { %v1060_v25 = vpop.eup %1059 }
 0x250   : > { %v451_v26 = vmul.f32 %v1060_v25, %v1046_v54  ;;  %v1062_v27 = vpop.eup %1061 }
 0x251   : > { %v621_v28 = vsel %vm429_vm2, %v1062_v27, 0.0 }
 0x252   : > { %951 = vmatmul.msk.f32.gmra.mxu1 %vm429_vm2, %v451_v26 }
 0x255   : > { %622 = vadd.xlane.f32.xlu0 %v621_v28 }
 0x258   : > { %717 = vrot.lane.b32.xlu2 %v1412_v33, %s1211_s26  ;;  %s835_s26 = sshll.u32 %s832_s19, 4  ;;  %s836_s26 = int_to_ptr.hbm [resolvable:$true] %s835_s26 }
 0x2a8   : > { %v530_v29 = vpop.xlane.xlu1 %529 }
 0x2a9   : > { %1063 = vrcp.f32 %v530_v29 }
 0x2af   : > { %v1064_v30 = vpop.eup %1063 }
 0x2b0   : > { %v533_v31 = vpop.xlane.xlu0 %532  ;;  %v536_v32 = vmul.f32 %v1064_v30, %v1048_v61  ;;  %v783_v61 = vld [vmem:[%s1512_s5 + $0x18] sm:$0xff] }
 0x2b1   : > { %1065 = vrcp.f32 %v533_v31  ;;  %807 = vmatpush.msra.mxu0 %v783_v61 }
 0x2b2   : > { %955 = vmatmul.msk.f32.vlgmr.msrb.gmra.mxu3 %vm429_vm2, %v536_v32 }
 0x2b3   : > { %v620_v34 = vpop.xlane.xlu2 %619  ;;  %808 = vmatpush.msra.mxu0 %v782_v62 }
 0x2b4   : > { %1067 = vrcp.f32 %v620_v34 }
 0x2b5   : > { %809 = vmatpush.msra.mxu0 %v781_v63 }
 0x2b7   : > { %v1066_v35 = vpop.eup %1065  ;;  %810 = vmatpush.msra.mxu0 %v780_v0 }
 0x2b8   : > { %v709_v36 = vpop.xlane.xlu0 %708  ;;  %v537_v37 = vmul.f32 %v1066_v35, %v1050_v6 }
 0x2b9   : > { %1069 = vrcp.f32 %v709_v36 }
 0x2ba   : > { %956 = vmatmul.msk.f32.gmra.mxu3 %vm429_vm2, %v537_v37  ;;  %v1068_v39 = vpop.eup %1067 }
 0x2bb   : > { %v718_v38 = vpop.permute.xlu2 %717  ;;  %v626_v40 = vmul.f32 %v1068_v39, %v1052_v9 }
 0x2bc   : > { %741 = vmatpush.msra.mxu3 %v718_v38 }
 0x2bf   : > { %v1070_v33 = vpop.eup %1069  ;;  %v475_v49 = vpop.f32.mrf.mxu1 }
 0x2c0   : > { %v715_v41 = vmul.f32 %v1070_v33, %v1056_v16  ;;  %v629_v42 = vpop.permute.xlu1 %628  ;;  %v712_v43 = vpop.xlane.xlu0 %711 }
 0x2c1   : > { %652 = vmatpush.msra.mxu1 %v629_v42  ;;  %1071 = vrcp.f32 %v712_v43 }
 0x2c2   : > { %960 = vmatmul.msk.f32.vlgmr.msra.gmra.mxu1 %vm429_vm2, %v626_v40  ;;  %965 = vmatmul.msk.f32.vlgmr.msra.gmra.mxu3 %vm429_vm2, %v715_v41 }
 0x2c7   : > { %v1072_v44 = vpop.eup %1071 }
 0x2c8   : > { %v623_v45 = vpop.xlane.xlu0 %622  ;;  %v716_v46 = vmul.f32 %v1072_v44, %v1058_v22 }
 0x2c9   : > { %1073 = vrcp.f32 %v623_v45 }
 0x2ca   : > { %966 = vmatmul.msk.f32.gmra.mxu3 %vm429_vm2, %v716_v46 }
 0x2cf   : > { %v1074_v47 = vpop.eup %1073  ;;  %v478_v51 = vpop.f32.mrf.mxu1 }
 0x2d0   : > { %v627_v48 = vmul.f32 %v1074_v47, %v1062_v27 }
 0x2d2   : > { %961 = vmatmul.msk.f32.gmra.mxu1 %vm429_vm2, %v627_v48 }
 0x335   : > { %v565_v50 = vpop.f32.mrf.mxu3 }
 0x336   : > { %751 = vrot.lane.b32.xlu0 %v565_v50, %s1213_s27 }
 0x33d   : > { %v568_v52 = vpop.f32.mrf.mxu3 }
 0x33e   : > { %753 = vrot.lane.b32.xlu2 %v568_v52, %s1213_s27  ;;  %s1149_s27 = sshra.s32 %s836_s26, 4  ;;  %s1150_s27 = int_to_ptr.hbm [resolvable:$true] %s1149_s27 }
 0x33f   : > { %v654_v53 = vpop.f32.mrf.mxu1  ;;  %s1151_s28 = scalar_lea.hbm %s1150_s27, 16  ;;  %p1156_p8 = scmp.lt.s32.totalorder %s1150_s27, %s1513_s6 }
 0x340   : > { %759 = vrot.lane.b32.xlu1 %v654_v53, %s1214_s7  ;;  %p1152_p1 = scmp.ne.s32.totalorder %s1150_s27, %s1151_s28  ;;  %p1157_p7 = scmp.lt.s32.totalorder %s1155_s29, %s1151_s28 }
 0x342   : > { %p1153_p5 = pnand %p1152_p1, %p1313_p13  ;;  %p1158_p9 = por %p1157_p7, %p1156_p8 }
 0x344   : > { %p1154_p12 = pneg %p1153_p5 }
 0x345   : > { %v743_v54 = vpop.f32.mrf.mxu3 }
 0x346   : > { %p1159_p10 = pnand %p1158_p9, %p1154_p12 }
 0x348   : > { %767 = vrot.lane.b32.xlu1 %v743_v54, %s1215_s20 }
 0x34d   : > { %v746_v55 = vpop.f32.mrf.mxu3 }
 0x34e   : > { %769 = vrot.lane.b32.xlu0 %v746_v55, %s1215_s20 }
 0x34f   : > { %v657_v56 = vpop.f32.mrf.mxu1 }
 0x350   : > { %761 = vrot.lane.b32.xlu1 %v657_v56, %s1214_s7 }
 0x398   : > { %v754_v7 = vpop.permute.xlu2 %753 }
 0x399   : > { %v774_v8 = vsel %vm396_vm1, %v478_v51, %v754_v7 }
 0x3a8   : > { %v752_v2 = vpop.permute.xlu0 %751 }
 0x3a9   : > { %v773_v3 = vsel %vm396_vm1, %v475_v49, %v752_v2 }
 0x3b2   : > { %v760_v1 = vpop.permute.xlu1 %759 }
 0x3b3   : > { %v775_v4 = vsel %vm313_vm0, %v773_v3, %v760_v1 }
 0x3ba   : > { %v768_v5 = vpop.permute.xlu1 %767 }
 0x3bb   : > { %v778_v6 = vsel %vm777_vm3, %v775_v4, %v768_v5 }
 0x3bc   : > { %967 = vmatmul.msk.f32.vlgmr.msra.gmra.mxu0 %vm788_vm4, %v778_v6 }
 0x3c0   : > { %v770_v10 = vpop.permute.xlu0 %769 }
 0x3c2   : > { %v762_v9 = vpop.permute.xlu1 %761 }
 0x3c3   : > { %v776_v11 = vsel %vm313_vm0, %v774_v8, %v762_v9 }
 0x3c4   : > { %v779_v12 = vsel %vm777_vm3, %v776_v11, %v770_v10 }
 0x3c5   : > { %968 = vmatmul.msk.f32.gmra.mxu0 %vm788_vm4, %v779_v12 }
 0x439   : > { %v812_v13 = vpop.f32.mrf.mxu0 }
 0x43a   : > { %818 = vst.msk [vmem:[%s300_s12] sm:$0xff] %vm313_vm0, %v812_v13 }
 0x442   : > { %v815_v14 = vpop.f32.mrf.mxu0 }
 0x443   : > { %819 = vst.msk [vmem:[%s300_s12 + $0x8] sm:$0xff] %vm313_vm0, %v815_v14 }
 0x444   : > { %1162 = shalt.err (!%p1159_p10)
}
 0x445   : > { %s1216_s17 = smov 128   ;;  %s1217_s10 = smov 8  }
 0x446   : > { %982 = dma.vmem_to_hbm [thread:$0]  (%p1313_p13), %s834_s30, 256, %s836_s26, %s821_s25, %s1216_s17, %s1216_s17, %s1217_s10  }
 0x447 PF: > { %s850_s12 = sand.u32 1, %s1193_s21   ;;  %p1519_p11 = scmp.ge.s32.totalorder %s1205_s24, 2 }
 0x448   : > { %s851_s15 = scalar_lea.sflag [#allocation4], %s850_s12 }
 0x449   : > { %p993_p0 = pnand %p1519_p11, %p1318_p4 }
 0x44b   : > { %p994_p2 = pneg %p993_p0 }
 0x44d   : > { %1188 = dma.done.wait (%p994_p2), %s851_s15, 256  }
 0x44e   : > { %1190 = vsyncadd (%p994_p2), %s851_s15, 4294967040  ;;  %p20_p6 = scmp.ge.s32.totalorder %s1293_s11, 4   ;;  %s1520_s21 = smov %s1197_s22 }
 0x44f   : > { %s1521_s22 = smov %s1201_s23  ;;  %s1522_s23 = smov %s1305_s14 }
 0x450   : > { %s1523_s24 = smov %s1293_s11  ;;  %22 = sbr.rel (!%p20_p6) target bundleno = 6 (0x6), region = 96 }
 0x455   :  { %857 = vsyncpa [#allocation3], 1 }
 0x456   :  { %859 = vsyncpa [#allocation3 + $0x1], 1 }
 0x457   :  { %860 = vsyncpa [#allocation6], 1 }
 0x458   :  { %861 = vsyncpa [#allocation4], 1 }
 0x459   :  { %863 = vsyncpa [#allocation4 + $0x1], 1 }

</bundles_post_ra>
